<compile_context>
chip_gen: v6e
topology: v6e:2x2x1
jax: 0.10.0
libtpu: 0.0.40
codegen_flags: <defaults>
</compile_context>

<pallas_src>
import jax
import jax.numpy as jnp
from jax.experimental import pallas as pl
from jax.experimental.pallas import tpu as pltpu


def _round_up(x, m):
    return ((x + m - 1) // m) * m


def _pad2d(a, rows, cols):
    r, c = a.shape
    if r == rows and c == cols:
        return a
    return jnp.pad(a, ((0, rows - r), (0, cols - c)))


# ----------------------------- Pallas kernels ------------------------------

def _mlp_l2norm_kernel(x_ref, w1_ref, b1_ref, w2_ref, b2_ref, o_ref):
    # x:  [TILE_M, C_in_p] (bf16)   w1: [C_in_p, nc_p] (bf16)   b1: [1, nc_p] (f32)
    # w2: [nc_p, nc_p]     (bf16)   b2: [1, nc_p]      (f32)    o:  [TILE_M, nc_p]
    h = jnp.dot(x_ref[...], w1_ref[...],
                preferred_element_type=jnp.float32) + b1_ref[...]
    h = jnp.maximum(h, 0.0)                                       # ReLU, f32 VPU
    y = jnp.dot(h.astype(w2_ref.dtype), w2_ref[...],
                preferred_element_type=jnp.float32) + b2_ref[...]
    # Normalize(power=2): y / (||y||_2 + 1e-7) along the feature dim.  The
    # reciprocal runs on the otherwise-idle EUP slot.
    norm = jnp.sqrt(jnp.sum(y * y, axis=-1, keepdims=True))
    inv = pl.reciprocal(norm + 1e-7, approx=True)
    o_ref[...] = (y * inv).astype(o_ref.dtype)


def _l2norm_kernel(x_ref, o_ref):
    x = x_ref[...].astype(jnp.float32)
    norm = jnp.sqrt(jnp.sum(x * x, axis=-1, keepdims=True))
    inv = pl.reciprocal(norm + 1e-7, approx=True)
    o_ref[...] = (x * inv).astype(o_ref.dtype)


# Safe on v5e/v6e (128 MiB physical) and below v7x's 64 MiB-per-TC physical.
_VMEM_LIMIT = 32 * 1024 * 1024


def mlp_l2norm_pallas(x, w1, b1, w2, b2, *, tile_m=256,
                      compute_dtype=jnp.bfloat16):
    """[N, C_in] -> [N, nc]: Linear -> ReLU -> Linear -> row-wise L2 norm.

    Rows are tiled (pipelined, megacore-parallel); weights stay VMEM-resident.
    tile_m=256 matches the 2x256^2 MXU on v6e/v7x; prefer 128 on v5e.
    """
    N, c_in = x.shape
    nc = w1.shape[1]

    c_in_p = _round_up(c_in, 128)          # lane-dense feature dims
    nc_p = _round_up(nc, 128)
    tile_m = min(tile_m, _round_up(N, 16))  # multiple of 16 (bf16 sublane pack)
    n_p = _round_up(N, tile_m)

    x_p = _pad2d(x, n_p, c_in_p).astype(compute_dtype)
    w1_p = _pad2d(w1, c_in_p, nc_p).astype(compute_dtype)
    w2_p = _pad2d(w2, nc_p, nc_p).astype(compute_dtype)
    b1_p = _pad2d(b1.reshape(1, nc), 1, nc_p).astype(jnp.float32)
    b2_p = _pad2d(b2.reshape(1, nc), 1, nc_p).astype(jnp.float32)

    out = pl.pallas_call(
        _mlp_l2norm_kernel,
        out_shape=jax.ShapeDtypeStruct((n_p, nc_p), jnp.float32),
        grid=(n_p // tile_m,),
        in_specs=[
            pl.BlockSpec((tile_m, c_in_p), lambda i: (i, 0)),
            # Weights/biases: constant index_map -> resident across grid steps.
            pl.BlockSpec((c_in_p, nc_p), lambda i: (0, 0)),
            pl.BlockSpec((1, nc_p), lambda i: (0, 0)),
            pl.BlockSpec((nc_p, nc_p), lambda i: (0, 0)),
            pl.BlockSpec((1, nc_p), lambda i: (0, 0)),
        ],
        out_specs=pl.BlockSpec((tile_m, nc_p), lambda i: (i, 0)),
        compiler_params=pltpu.CompilerParams(
            dimension_semantics=("parallel",),
            vmem_limit_bytes=_VMEM_LIMIT),
    )(x_p, w1_p, b1_p, w2_p, b2_p)
    # Padded weight/bias columns are exactly zero, so the norm over nc_p
    # columns equals the norm over the real nc columns; just slice.
    return out[:N, :nc]


def l2norm_pallas(x, *, tile_m=512):
    """[N, C] -> row-wise L2 normalized [N, C] (mem-bound; large row tiles)."""
    N, C = x.shape
    c_p = _round_up(C, 128)
    tile_m = min(tile_m, _round_up(N, 16))
    n_p = _round_up(N, tile_m)
    x_p = _pad2d(x, n_p, c_p).astype(jnp.float32)
    out = pl.pallas_call(
        _l2norm_kernel,
        out_shape=jax.ShapeDtypeStruct((n_p, c_p), jnp.float32),
        grid=(n_p // tile_m,),
        in_specs=[pl.BlockSpec((tile_m, c_p), lambda i: (i, 0))],
        out_specs=pl.BlockSpec((tile_m, c_p), lambda i: (i, 0)),
        compiler_params=pltpu.CompilerParams(
            dimension_semantics=("parallel",),
            vmem_limit_bytes=_VMEM_LIMIT),
    )(x_p)
    return out[:N, :C]


# ------------------------------ module wrapper ------------------------------

class PatchSampleF:
    """JAX/Pallas re-implementation of the PyTorch PatchSampleF forward."""

    def __init__(self, use_mlp=False, init_type="normal", init_gain=0.02,
                 nc=256, key=None):
        self.use_mlp = use_mlp
        self.nc = nc
        self.init_type = init_type
        self.init_gain = init_gain
        self.mlp_init = False
        self.mlps = {}
        self._key = key if key is not None else jax.random.PRNGKey(0)

    def create_mlp(self, feature_dims):
        # init_net with 'normal': weight ~ N(0, init_gain), bias = 0
        key = self._key
        for mlp_id, input_nc in enumerate(feature_dims):
            key, k1, k2 = jax.random.split(key, 3)
            w1 = self.init_gain * jax.random.normal(
                k1, (input_nc, self.nc), jnp.float32)
            b1 = jnp.zeros((self.nc,), jnp.float32)
            w2 = self.init_gain * jax.random.normal(
                k2, (self.nc, self.nc), jnp.float32)
            b2 = jnp.zeros((self.nc,), jnp.float32)
            self.mlps[mlp_id] = (w1, b1, w2, b2)
        self.mlp_init = True

    def __call__(self, feats, num_patches=64, patch_ids=None, key=None):
        return_ids = []
        return_feats = []
        if self.use_mlp and not self.mlp_init:
            self.create_mlp([f.shape[1] for f in feats])  # NCHW channel dim
        if key is None:
            key = jax.random.PRNGKey(1)

        for feat_id, feat in enumerate(feats):
            B, C, H, W = feat.shape
            feat_flat = feat.reshape(B, C, H * W)   # NCHW flat; no transpose yet

            if num_patches > 0:
                if patch_ids is not None:
                    patch_id = jnp.asarray(patch_ids[feat_id], jnp.int32)
                else:
                    key, sub = jax.random.split(key)
                    patch_id = jax.random.permutation(sub, H * W)[
                        : int(min(num_patches, H * W))].astype(jnp.int32)
                # Gather-first: select P spatial positions in the NCHW layout,
                # then transpose only the [B, C, P] slab -> [B*P, C].  This is
                # equivalent to permute(0,2,3,1).view(B,HW,C)[:, patch_id, :]
                # but avoids transposing the whole feature map.
                # TODO(synk): the gather could be fused into the Pallas kernel
                # via PrefetchScalarGridSpec (patch_id in SMEM) to remove this
                # HBM round trip entirely.
                x_sample = jnp.transpose(
                    feat_flat[:, :, patch_id], (0, 2, 1)).reshape(-1, C)
            else:
                # TODO(synk): the num_patches == 0 output-reshape branch in the
                # reference uses undefined B/H/W (bug in the source module);
                # only the flattened [B*H*W, C] normalized result is produced.
                x_sample = jnp.transpose(feat_flat, (0, 2, 1)).reshape(-1, C)
                patch_id = jnp.zeros((0,), jnp.int32)

            if self.use_mlp:
                w1, b1, w2, b2 = self.mlps[feat_id]
                x_sample = mlp_l2norm_pallas(x_sample, w1, b1, w2, b2)
            else:
                x_sample = l2norm_pallas(x_sample)

            return_ids.append(patch_id)
            return_feats.append(x_sample)
        return return_feats, return_ids


# --------------------------------- reference --------------------------------

def _ref_forward(x, w1, b1, w2, b2, compute_dtype=jnp.bfloat16):
    # Mirrors the kernel's bf16-matmul / f32-accumulate path.
    xc = x.astype(compute_dtype)
    h = jnp.dot(xc, w1.astype(compute_dtype),
                preferred_element_type=jnp.float32) + b1
    h = jnp.maximum(h, 0.0)
    y = jnp.dot(h.astype(compute_dtype), w2.astype(compute_dtype),
                preferred_element_type=jnp.float32) + b2
    norm = jnp.sqrt(jnp.sum(y * y, axis=-1, keepdims=True))
    return y / (norm + 1e-7)


# ----------------------------------- main ------------------------------------

if __name__ == "__main__":
    B, C, H, W = 2, 4, 16, 16
    num_patches = 8
    nc = 32

    root = jax.random.PRNGKey(0)
    k_feat, k_mlp, k_patch = jax.random.split(root, 3)
    feat = jax.random.normal(k_feat, (B, C, H, W), jnp.float32)

    # --- MLP path (use_mlp=True): fused MLP + L2-norm kernel -----------------
    model = PatchSampleF(use_mlp=True, init_type="normal",
                         init_gain=0.02, nc=nc, key=k_mlp)
    feats_out, ids_out = model([feat], num_patches=num_patches, key=k_patch)
    out = jax.block_until_ready(feats_out[0])
    assert out.shape == (B * num_patches, nc), out.shape

    patch_id = ids_out[0]
    feat_reshape = jnp.transpose(feat, (0, 2, 3, 1)).reshape(B, H * W, C)
    x_gather = feat_reshape[:, patch_id, :].reshape(-1, C)
    w1, b1, w2, b2 = model.mlps[0]
    ref = _ref_forward(x_gather, w1, b1, w2, b2)
    err = float(jnp.max(jnp.abs(out - ref)))
    assert err < 2e-2, err   # approx-reciprocal / bf16 tolerance

    # --- no-MLP path: pure row-wise L2 normalize kernel -----------------------
    model2 = PatchSampleF(use_mlp=False, nc=nc)
    feats2_out, _ = model2([feat], num_patches=num_patches,
                           patch_ids=[patch_id])
    out2 = jax.block_until_ready(feats2_out[0])
    ref2 = x_gather / (jnp.sqrt(jnp.sum(x_gather * x_gather, axis=-1,
                                        keepdims=True)) + 1e-7)
    err2 = float(jnp.max(jnp.abs(out2 - ref2)))
    assert err2 < 2e-2, err2

    print("KERNEL_OK")
</pallas_src>

<mosaic_0001>
module attributes {stable_mosaic.version = 11 : i64} {
  func.func @_mlp_l2norm_kernel(%arg0: i32, %arg1: memref<16x128xbf16, #tpu.memory_space<vmem>>, %arg2: memref<128x128xbf16, #tpu.memory_space<vmem>>, %arg3: memref<1x128xf32, #tpu.memory_space<vmem>>, %arg4: memref<128x128xbf16, #tpu.memory_space<vmem>>, %arg5: memref<1x128xf32, #tpu.memory_space<vmem>>, %arg6: memref<16x128xf32, #tpu.memory_space<vmem>>) attributes {dimension_semantics = [#tpu.dimension_semantics<parallel>], iteration_bounds = array<i64: 1>, scalar_prefetch = 0 : i64, scratch_operands = 0 : i64, tpu.core_type = #tpu.core_type<tc>, window_params = [{transform_indices = @transform_0, window_bounds = array<i64: 16, 128>}, {pipeline_mode = #tpu.pipeline_mode<synchronous>, transform_indices = @transform_1, window_bounds = array<i64: 128, 128>}, {pipeline_mode = #tpu.pipeline_mode<synchronous>, transform_indices = @transform_2, window_bounds = array<i64: 1, 128>}, {pipeline_mode = #tpu.pipeline_mode<synchronous>, transform_indices = @transform_3, window_bounds = array<i64: 128, 128>}, {pipeline_mode = #tpu.pipeline_mode<synchronous>, transform_indices = @transform_4, window_bounds = array<i64: 1, 128>}, {transform_indices = @transform_5, window_bounds = array<i64: 16, 128>}]} {
    %c0 = arith.constant 0 : index
    %c0_0 = arith.constant 0 : index
    %0 = vector.load %arg1[%c0, %c0_0] : memref<16x128xbf16, #tpu.memory_space<vmem>>, vector<16x128xbf16>
    %c0_1 = arith.constant 0 : index
    %c0_2 = arith.constant 0 : index
    %1 = vector.load %arg2[%c0_1, %c0_2] : memref<128x128xbf16, #tpu.memory_space<vmem>>, vector<128x128xbf16>
    %cst = arith.constant dense<0.000000e+00> : vector<16x128xf32>
    %2 = tpu.matmul %0, %1, %cst {dimension_numbers = #tpu.dot_dimension_numbers<[1], [0], [0], [1], [0, 0, 1, 1], [], []>} : vector<16x128xbf16>, vector<128x128xbf16>, vector<16x128xf32> -> vector<16x128xf32>
    %c0_3 = arith.constant 0 : index
    %c0_4 = arith.constant 0 : index
    %3 = vector.load %arg3[%c0_3, %c0_4] : memref<1x128xf32, #tpu.memory_space<vmem>>, vector<1x128xf32>
    %4 = vector.broadcast %3 : vector<1x128xf32> to vector<16x128xf32>
    %5 = arith.addf %2, %4 : vector<16x128xf32>
    %cst_5 = arith.constant 0.000000e+00 : f32
    %6 = vector.broadcast %cst_5 : f32 to vector<16x128xf32>
    %7 = arith.maximumf %5, %6 : vector<16x128xf32>
    %8 = arith.truncf %7 : vector<16x128xf32> to vector<16x128xbf16>
    %c0_6 = arith.constant 0 : index
    %c0_7 = arith.constant 0 : index
    %9 = vector.load %arg4[%c0_6, %c0_7] : memref<128x128xbf16, #tpu.memory_space<vmem>>, vector<128x128xbf16>
    %cst_8 = arith.constant dense<0.000000e+00> : vector<16x128xf32>
    %10 = tpu.matmul %8, %9, %cst_8 {dimension_numbers = #tpu.dot_dimension_numbers<[1], [0], [0], [1], [0, 0, 1, 1], [], []>} : vector<16x128xbf16>, vector<128x128xbf16>, vector<16x128xf32> -> vector<16x128xf32>
    %c0_9 = arith.constant 0 : index
    %c0_10 = arith.constant 0 : index
    %11 = vector.load %arg5[%c0_9, %c0_10] : memref<1x128xf32, #tpu.memory_space<vmem>>, vector<1x128xf32>
    %12 = vector.broadcast %11 : vector<1x128xf32> to vector<16x128xf32>
    %13 = arith.addf %10, %12 : vector<16x128xf32>
    %14 = arith.mulf %13, %13 : vector<16x128xf32>
    %cst_11 = arith.constant dense<0.000000e+00> : vector<16xf32>
    %15 = vector.multi_reduction <add>, %14, %cst_11 [1] : vector<16x128xf32> to vector<16xf32>
    %16 = vector.shape_cast %15 : vector<16xf32> to vector<16x1xf32>
    %17 = math.sqrt %16 : vector<16x1xf32>
    %cst_12 = arith.constant 1.000000e-07 : f32
    %18 = vector.broadcast %cst_12 : f32 to vector<16x1xf32>
    %19 = arith.addf %17, %18 : vector<16x1xf32>
    %20 = tpu.reciprocal %19 {approx = true} : vector<16x1xf32> -> vector<16x1xf32>
    %21 = vector.broadcast %20 : vector<16x1xf32> to vector<16x128xf32>
    %22 = arith.mulf %13, %21 : vector<16x128xf32>
    %c0_13 = arith.constant 0 : index
    %c0_14 = arith.constant 0 : index
    %23 = vector.load %arg6[%c0_13, %c0_14] : memref<16x128xf32, #tpu.memory_space<vmem>>, vector<16x128xf32>
    tpu.vector_store %arg6[%c0_13, %c0_14], %22 {strides = array<i32>} : memref<16x128xf32, #tpu.memory_space<vmem>>, vector<16x128xf32>,
    return
  }
  func.func @transform_0(%arg0: i32) -> (i32, i32) {
    %c0_i32 = arith.constant 0 : i32
    %c0_i32_0 = arith.constant 0 : i32
    return %arg0, %c0_i32 : i32, i32
  }
  func.func @transform_1(%arg0: i32) -> (i32, i32) {
    %c0_i32 = arith.constant 0 : i32
    %c0_i32_0 = arith.constant 0 : i32
    %c0_i32_1 = arith.constant 0 : i32
    return %c0_i32, %c0_i32_0 : i32, i32
  }
  func.func @transform_2(%arg0: i32) -> (i32, i32) {
    %c0_i32 = arith.constant 0 : i32
    %c0_i32_0 = arith.constant 0 : i32
    %c0_i32_1 = arith.constant 0 : i32
    return %c0_i32, %c0_i32_0 : i32, i32
  }
  func.func @transform_3(%arg0: i32) -> (i32, i32) {
    %c0_i32 = arith.constant 0 : i32
    %c0_i32_0 = arith.constant 0 : i32
    %c0_i32_1 = arith.constant 0 : i32
    return %c0_i32, %c0_i32_0 : i32, i32
  }
  func.func @transform_4(%arg0: i32) -> (i32, i32) {
    %c0_i32 = arith.constant 0 : i32
    %c0_i32_0 = arith.constant 0 : i32
    %c0_i32_1 = arith.constant 0 : i32
    return %c0_i32, %c0_i32_0 : i32, i32
  }
  func.func @transform_5(%arg0: i32) -> (i32, i32) {
    %c0_i32 = arith.constant 0 : i32
    %c0_i32_0 = arith.constant 0 : i32
    return %arg0, %c0_i32 : i32, i32
  }
}

</mosaic_0001>

<bundles_post_ra>
// kernel: tpu_custom_call.1
= control target key start
LH: loop header
LB: loop body
LE: loop exit
PB: predicated region body
PF: predicated region fallthrough
CT: control target
= control target key end

     0   :  { %10 = vsyncpa [#allocation3], 0  ;;  %s600_s0 = inlined_call_operand.hbm [shape: bf16[16,128], index: 0, kind: input, shape index: {}]   ;;  %s601_s1 = inlined_call_operand.hbm [shape: bf16[128,128], index: 1, kind: input, shape index: {}]   ;;  %s602_s2 = inlined_call_operand.vmem [shape: f32[1,128], index: 2, kind: input, shape index: {}]   ;;  %s603_s3 = inlined_call_operand.hbm [shape: bf16[128,128], index: 3, kind: input, shape index: {}]   ;;  %s604_s4 = inlined_call_operand.vmem [shape: f32[1,128], index: 4, kind: input, shape index: {}]   ;;  %s605_s5 = inlined_call_operand.hbm [shape: f32[16,128], index: 5, kind: output, shape index: {}]  }
   0x1   :  { %11 = vsyncpa [#allocation6], 0 }
   0x2   :  { %12 = vsyncpa [#allocation4], 0  ;;  %s542_s18 = smov [#allocation5]   ;;  %s543_s20 = smov [#allocation2]  }
   0x3   :  { %s30_s19 = sshll.u32 %s542_s18, 4  ;;  %s18_s21 = sshll.u32 %s543_s20, 4  ;;  %s31_s19 = int_to_ptr.vmem [resolvable:$true] %s30_s19  ;;  %s19_s21 = int_to_ptr.vmem [resolvable:$true] %s18_s21 }
   0x4   :  { %s464_s22 = scalar_lea.vmem %s31_s19, 1024  ;;  %p469_p1 = scmp.lt.s32.totalorder %s31_s19, %s31_s19 }
   0x5   :  { %p465_p0 = scmp.ne.s32.totalorder %s31_s19, %s464_s22  ;;  %p470_p2 = scmp.lt.s32.totalorder %s464_s22, %s464_s22 }
   0x7   :  { %p471_p3 = por %p470_p2, %p469_p1 }
   0x9   :  { %p472_p4 = pnand %p471_p3, %p465_p0 }
   0xb   :  { %475 = shalt.err (!%p472_p4)
}
   0xc   :  { %s544_s23 = smov 64   ;;  %s545_s24 = smov 4  }
   0xd   :  { %36 = dma.hbm_to_vmem [thread:$0]  %s601_s1, 1024, %s31_s19, [#allocation6], %s544_s23, %s544_s23, %s545_s24  }
   0xe   :  { %s484_s27 = scalar_lea.vmem %s19_s21, 128  ;;  %p489_p6 = scmp.lt.s32.totalorder %s19_s21, %s19_s21 }
   0xf   :  { %p485_p5 = scmp.ne.s32.totalorder %s19_s21, %s484_s27  ;;  %p490_p7 = scmp.lt.s32.totalorder %s484_s27, %s484_s27 }
  0x11   :  { %p491_p8 = por %p490_p7, %p489_p6 }
  0x13   :  { %p492_p9 = pnand %p491_p8, %p485_p5 }
  0x15   :  { %495 = shalt.err (!%p492_p9)
}
  0x16   :  { %24 = dma.hbm_to_vmem [thread:$0]  %s600_s0, 128, %s19_s21, [#allocation3], %s544_s23, %s544_s23, %s545_s24  }
  0x17   :  { %s546_s30 = smov [#allocation7]  }
  0x18   :  { %s44_s6 = sshll.u32 %s546_s30, 4  ;;  %s45_s6 = int_to_ptr.vmem [resolvable:$true] %s44_s6 }
  0x19   :  { %s504_s7 = scalar_lea.vmem %s45_s6, 1024  ;;  %p509_p11 = scmp.lt.s32.totalorder %s45_s6, %s45_s6 }
  0x1a   :  { %p505_p10 = scmp.ne.s32.totalorder %s45_s6, %s504_s7  ;;  %p510_p12 = scmp.lt.s32.totalorder %s504_s7, %s504_s7 }
  0x1c   :  { %p511_p13 = por %p510_p12, %p509_p11 }
  0x1e   :  { %p512_p0 = pnand %p511_p13, %p505_p10 }
  0x20   :  { %515 = shalt.err (!%p512_p0)
}
  0x21   :  { %50 = dma.hbm_to_vmem [thread:$0]  %s603_s3, 1024, %s45_s6, [#allocation6], %s544_s23, %s544_s23, %s545_s24  }
  0x22   :  { %536 = dma.done.wait [#allocation3], 128  }
  0x23   :  { %537 = vsyncadd [#allocation3], 4294967168 }
  0x24   :  { %538 = dma.done.wait [#allocation6], 2048  }
  0x25   :  { %539 = vsyncadd [#allocation6], 4294965248  ;;  %v547_v0 = vmov 0.0   ;;  %vm548_vm0 = vmmov 0   ;;  %v431_v1 = vld [vmem:[#allocation5 + $0x38] sm:$0xff]   ;;  %v432_v2 = vld [vmem:[#allocation5 + $0x30] sm:$0xff]  }
  0x26   :  { %381 = vmatprep.subr.bf16.mxu0 %v547_v0  ;;  %397 = vmatprep.mubr.msk.bf16.mxu0 %vm548_vm0, %v547_v0  ;;  %v433_v3 = vld [vmem:[#allocation5 + $0x28] sm:$0xff]   ;;  %v440_v4 = vld [vmem:[#allocation7 + $0x38] sm:$0xff]   ;;  %v434_v5 = vld [vmem:[#allocation5 + $0x20] sm:$0xff]  }
  0x27   :  { %401 = vmatprep.subr.bf16.mxu1 %v547_v0  ;;  %417 = vmatprep.mubr.msk.bf16.mxu1 %vm548_vm0, %v547_v0  ;;  %v441_v6 = vld [vmem:[#allocation7 + $0x30] sm:$0xff]   ;;  %v435_v7 = vld [vmem:[#allocation5 + $0x18] sm:$0xff]   ;;  %v442_v8 = vld [vmem:[#allocation7 + $0x28] sm:$0xff]  }
  0x28   :  { %382 = vmatpush3.bf16.msra.mxu0 %v431_v1  ;;  %402 = vmatpush3.bf16.msra.mxu1 %v440_v4  ;;  %v436_v9 = vld [vmem:[#allocation5 + $0x10] sm:$0xff]   ;;  %v443_v10 = vld [vmem:[#allocation7 + $0x20] sm:$0xff]   ;;  %v437_v11 = vld [vmem:[#allocation5 + $0x8] sm:$0xff]  }
  0x29   :  { %383 = vmatprep.subr.bf16.mxu0 %v547_v0  ;;  %403 = vmatprep.subr.bf16.mxu1 %v547_v0  ;;  %v444_v12 = vld [vmem:[#allocation7 + $0x18] sm:$0xff]   ;;  %v438_v13 = vld [vmem:[#allocation5] sm:$0xff]   ;;  %v445_v15 = vld [vmem:[#allocation7 + $0x10] sm:$0xff]  }
  0x2a   :  { %v439_v14 = vld [vmem:[#allocation2] sm:$0xff]   ;;  %v446_v16 = vld [vmem:[#allocation7 + $0x8] sm:$0xff]   ;;  %v447_v17 = vld [vmem:[#allocation7] sm:$0xff]  }
  0x2b   :  { %v344_v18 = vld [vmem:[%s602_s2] ss:$0 sm:$0xff]  ;;  %s549_s2 = smov [#allocation8]  }
  0x2c   :  { %384 = vmatpush3.bf16.msra.mxu0 %v432_v2  ;;  %404 = vmatpush3.bf16.msra.mxu1 %v441_v6  ;;  %v354_v28 = vld [vmem:[%s604_s4] ss:$0 sm:$0xff]  ;;  %s331_s4 = sshll.u32 %s549_s2, 4  ;;  %s332_s4 = int_to_ptr.vmem [resolvable:$true] %s331_s4 }
  0x2d   :  { %385 = vmatprep.subr.bf16.mxu0 %v547_v0  ;;  %405 = vmatprep.subr.bf16.mxu1 %v547_v0  ;;  %s516_s11 = scalar_lea.vmem %s332_s4, 256  ;;  %p521_p2 = scmp.lt.s32.totalorder %s332_s4, %s332_s4 }
  0x2e   :  { %p517_p1 = scmp.ne.s32.totalorder %s332_s4, %s516_s11  ;;  %p522_p3 = scmp.lt.s32.totalorder %s516_s11, %s516_s11 }
  0x30   :  { %386 = vmatpush3.bf16.msra.mxu0 %v433_v3  ;;  %406 = vmatpush3.bf16.msra.mxu1 %v442_v8  ;;  %p523_p4 = por %p522_p3, %p521_p2 }
  0x31   :  { %387 = vmatprep.subr.bf16.mxu0 %v547_v0  ;;  %407 = vmatprep.subr.bf16.mxu1 %v547_v0 }
  0x32   :  { %p524_p5 = pnand %p523_p4, %p517_p1 }
  0x34   :  { %388 = vmatpush3.bf16.msra.mxu0 %v434_v5  ;;  %408 = vmatpush3.bf16.msra.mxu1 %v443_v10 }
  0x35   :  { %389 = vmatprep.subr.bf16.mxu0 %v547_v0  ;;  %409 = vmatprep.subr.bf16.mxu1 %v547_v0 }
  0x38   :  { %390 = vmatpush3.bf16.msra.mxu0 %v435_v7  ;;  %410 = vmatpush3.bf16.msra.mxu1 %v444_v12 }
  0x39   :  { %391 = vmatprep.subr.bf16.mxu0 %v547_v0  ;;  %411 = vmatprep.subr.bf16.mxu1 %v547_v0 }
  0x3c   :  { %392 = vmatpush3.bf16.msra.mxu0 %v436_v9  ;;  %412 = vmatpush3.bf16.msra.mxu1 %v445_v15 }
  0x3d   :  { %393 = vmatprep.subr.bf16.mxu0 %v547_v0  ;;  %413 = vmatprep.subr.bf16.mxu1 %v547_v0 }
  0x40   :  { %394 = vmatpush3.bf16.msra.mxu0 %v437_v11  ;;  %414 = vmatpush3.bf16.msra.mxu1 %v446_v16 }
  0x41   :  { %395 = vmatprep.subr.bf16.mxu0 %v547_v0  ;;  %415 = vmatprep.subr.bf16.mxu1 %v547_v0 }
  0x44   :  { %396 = vmatpush3.bf16.msra.mxu0 %v438_v13  ;;  %416 = vmatpush3.bf16.msra.mxu1 %v447_v17 }
  0x47   :  { %398 = vmatmul.mubr.bf16.vlgmr.msra.gmra.mxu0 %v439_v14 }
 0x107   :  { %v176_v19 = vpop.f32.mrf.mxu0 }
 0x108   :  { %v177_v21 = vadd.f32 %v344_v18, %v176_v19 }
 0x109   :  { %v399_v20 = vpop.f32.mrf.mxu0 }
 0x10a   :  { %v183_v25 = vmax.f32 %v177_v21, 0.0 }
 0x10b   :  { %v179_v22 = vpop.f32.mrf.mxu0 }
 0x10c   :  { %v180_v23 = vadd.f32 %v344_v18, %v179_v22 }
 0x10d   :  { %v400_v24 = vpop.f32.mrf.mxu0 }
 0x10e   :  { %v184_v26 = vmax.f32 %v180_v23, 0.0 }
 0x110   :  { %v185_v27 = vpack.c.bf16 %v184_v26, %v183_v25 }
 0x112   :  { %418 = vmatmul.mubr.bf16.vlgmr.msra.gmra.mxu1 %v185_v27 }
 0x1d2   :  { %v291_v29 = vpop.f32.mrf.mxu1 }
 0x1d3   :  { %v292_v30 = vadd.f32 %v354_v28, %v291_v29 }
 0x1d4   :  { %v419_v31 = vpop.f32.mrf.mxu1 }
 0x1d5   :  { %v298_v32 = vmul.f32 %v292_v30, %v292_v30 }
 0x1d6   :  { %v294_v33 = vpop.f32.mrf.mxu1 }
 0x1d7   :  { %v295_v34 = vadd.f32 %v354_v28, %v294_v33  ;;  %300 = vadd.xlane.f32.xlu0 %v298_v32 }
 0x1d8   :  { %v420_v35 = vpop.f32.mrf.mxu1 }
 0x1d9   :  { %v299_v36 = vmul.f32 %v295_v34, %v295_v34 }
 0x1db   :  { %302 = vadd.xlane.f32.xlu0 %v299_v36 }
 0x260   :  { %v301_v37 = vpop.xlane.xlu0 %300 }
 0x261   :  { %448 = vrsqrt.f32 %v301_v37  ;;  %vm306_vm1 = vcmp.eq.f32.partialorder %v301_v37, inf  ;;  %v309_v41 = vand.u32 2147483648, %v301_v37  ;;  %vm308_vm2 = vcmp.eq.f32.partialorder %v301_v37, 0.0 }
 0x264   :  { %v303_v38 = vpop.xlane.xlu0 %302 }
 0x265   :  { %450 = vrsqrt.f32 %v303_v38  ;;  %vm313_vm3 = vcmp.eq.f32.partialorder %v303_v38, inf  ;;  %v316_v47 = vand.u32 2147483648, %v303_v38  ;;  %vm315_vm4 = vcmp.eq.f32.partialorder %v303_v38, 0.0 }
 0x26e   :  { %v449_v39 = vpop.eup %448 }
 0x26f   :  { %v305_v40 = vmul.f32 %v449_v39, %v301_v37 }
 0x271   :  { %v307_v42 = vsel %vm306_vm1, %v301_v37, %v305_v40 }
 0x272   :  { %v451_v43 = vpop.eup %450  ;;  %v310_v44 = vsel %vm308_vm2, %v309_v41, %v307_v42 }
 0x273   :  { %v318_v45 = vadd.f32 1e-07, %v310_v44  ;;  %v312_v46 = vmul.f32 %v451_v43, %v303_v38 }
 0x275   :  { %452 = vrcp.f32 %v318_v45  ;;  %v314_v48 = vsel %vm313_vm3, %v303_v38, %v312_v46 }
 0x276   :  { %v317_v49 = vsel %vm315_vm4, %v316_v47, %v314_v48 }
 0x277   :  { %v319_v50 = vadd.f32 1e-07, %v317_v49 }
 0x279   :  { %454 = vrcp.f32 %v319_v50 }
 0x282   :  { %v453_v51 = vpop.eup %452 }
 0x283   :  { %v322_v52 = vmul.f32 %v453_v51, %v292_v30 }
 0x285   :  { %324 = vst [vmem:[#allocation8] sm:$0xff] %v322_v52 }
 0x286   :  { %v455_v53 = vpop.eup %454 }
 0x287   :  { %v323_v54 = vmul.f32 %v455_v53, %v295_v34 }
 0x289   :  { %325 = vst [vmem:[#allocation8 + $0x8] sm:$0xff] %v323_v54 }
 0x28a   :  { %527 = shalt.err (!%p524_p5)
}
 0x28b   :  { %s550_s12 = smov 128   ;;  %s551_s13 = smov 8  }
 0x28c   :  { %337 = dma.vmem_to_hbm [thread:$0]  %s332_s4, 256, %s605_s5, [#allocation4], %s550_s12, %s550_s12, %s551_s13  }
 0x28d   :  { %540 = dma.done.wait [#allocation4], 256  }
 0x28e   :  { %541 = vsyncadd [#allocation4], 4294967040 }
 0x28f   :  { %341 = vsyncpa [#allocation3], 1 }
 0x290   :  { %342 = vsyncpa [#allocation6], 1 }
 0x291   :  { %343 = vsyncpa [#allocation4], 1 }

</bundles_post_ra>
